<compile_context>
chip_gen: v5e
topology: v5e:2x2
jax: 0.10.0
libtpu: 0.0.40
codegen_flags: <defaults>
</compile_context>

<pallas_src>
import jax
import jax.numpy as jnp
from jax.experimental import pallas as pl
from jax.experimental.pallas import tpu as pltpu

LANE = 128


def _round_up(x, m):
    return (x + m - 1) // m * m


# ----------------------------- Pallas kernel ---------------------------------
def _make_fftconv_kernel(B, Cin, Cout, use_mask):
    """out[(b,co), f] = sum_ci (x[(b,ci), f] * mask[f]) * k[(co,ci), f]  (complex, re/im split).

    Block layouts (lane-dense padded frequency axis Ft, sublane-dense rows):
      x_ref : (2, B*Cin,    Ft)   [0]=real, [1]=imag, rows ordered (b, ci)
      k_ref : (2, Cout*Cin, Ft)   rows ordered (co, ci)
      m_ref : (1, Ft)             only when use_mask
      o_ref : (2, B*Cout,   Ft)   rows ordered (b, co)
    """

    def kernel(*refs):
        if use_mask:
            x_ref, k_ref, m_ref, o_ref = refs
        else:
            x_ref, k_ref, o_ref = refs
        Ft = x_ref.shape[-1]

        # Full-sublane slab loads (8 / 16 rows): one dense load per operand.
        xr = x_ref[0]                                   # (B*Cin, Ft)
        xi = x_ref[1]
        if use_mask:
            m = m_ref[...]                              # (1, Ft); broadcast emitted once
            xr = xr * m                                 # mask applied once per x element
            xi = xi * m
        xr = xr.reshape(B, Cin, Ft)
        xi = xi.reshape(B, Cin, Ft)
        kr = k_ref[0].reshape(Cout, Cin, Ft)            # (Cout, Cin, Ft)
        ki = k_ref[1].reshape(Cout, Cin, Ft)

        # Static loop over the (small) batch dim.  Iterations are independent and each
        # writes its output rows directly into o_ref, so no accumulator is carried
        # across the unroll (flat vreg pressure even for large Ft).
        # TODO(synk): for very large Cout*Cin switch this to lax.fori_loop with a
        # VMEM-scratch accumulator; at these channel counts the static form is optimal.
        for b in range(B):
            xr_b = xr[b][None]                          # (1, Cin, Ft) -> broadcast over Cout
            xi_b = xi[b][None]
            prod_r = xr_b * kr - xi_b * ki              # (Cout, Cin, Ft)
            prod_i = xr_b * ki + xi_b * kr
            out_r = jnp.sum(prod_r, axis=1)             # (Cout, Ft): Cin contracted (XLU slack)
            out_i = jnp.sum(prod_i, axis=1)
            o_ref[0, b * Cout:(b + 1) * Cout, :] = out_r
            o_ref[1, b * Cout:(b + 1) * Cout, :] = out_i

    return kernel


# --------------------------- tiling / VMEM policy ----------------------------
def _vmem_budget_and_cap():
    """Generation-aware per-step VMEM budget plus the physical per-core capacity."""
    cap = 64 * 1024 * 1024                              # conservative default (v7x per-TC)
    try:
        cap = int(pltpu.get_tpu_info().vmem_capacity_bytes)
    except Exception:
        pass
    cap = max(cap, 32 * 1024 * 1024)
    kind = ""
    try:
        kind = jax.devices()[0].device_kind.lower()
    except Exception:
        pass
    if "v5e" in kind or ("v5" in kind and "lite" in kind):
        budget = 14 * 1024 * 1024                       # v5e: small scoped VMEM, 1 vst slot
    elif "v6" in kind:
        budget = 40 * 1024 * 1024                       # v6e: 128 MiB VMEM -> large tiles
    else:
        budget = 20 * 1024 * 1024                       # v7x / unknown: 64 MiB per TensorCore
    return min(budget, cap // 3), cap


def _choose_freq_tile(B, Cin, Cout, F, use_mask, budget_bytes):
    """Pad F only to 128 lanes, then pick a tile that divides the padded axis, fits the
    VMEM budget (double-buffered inputs + output + in-kernel temporaries), and leaves
    >= 4 grid steps when the problem permits (pipelining + both v7x TensorCores)."""
    Fp = _round_up(F, LANE)
    n128 = Fp // LANE
    words_per_lane = (2 * 2 * (B * Cin)                 # x (re+im), double-buffered
                      + 2 * 2 * (Cout * Cin)            # k (re+im), double-buffered
                      + (2 if use_mask else 0)          # mask, double-buffered
                      + 2 * 2 * (B * Cout)              # output, double-buffered
                      + 4 * (Cout * Cin))               # transient complex products
    bytes_per_lane = 4 * words_per_lane
    max_tiles128 = max(1, int(budget_bytes // (bytes_per_lane * LANE)))
    cands = [LANE * d for d in range(1, min(n128, max_tiles128) + 1) if n128 % d == 0]
    if not cands:
        cands = [LANE]
    pipelined = [t for t in cands if Fp // t >= 4]
    f_tile = max(pipelined) if pipelined else max(cands)
    return Fp, f_tile, bytes_per_lane


# ------------------------------ kernel wrapper --------------------------------
def fft_complex_mul_sum(fft_x, kernel_fft, mask):
    """Pallas-backed: out[b, co] = sum_ci (fft_x[b, ci] * mask) * kernel_fft[co, ci].

    fft_x      : (B, Cin, H, Wf)   complex
    kernel_fft : (Cout, Cin, H, Wf) complex
    mask       : (H, Wf) float32 or None
    returns    : (B, Cout, H, Wf) complex64
    """
    B, Cin, H, Wf = fft_x.shape
    Cout = kernel_fft.shape[0]
    F = H * Wf
    use_mask = mask is not None

    budget, cap = _vmem_budget_and_cap()
    Fp, f_tile, bytes_per_lane = _choose_freq_tile(B, Cin, Cout, F, use_mask, budget)
    pad = Fp - F

    def prep(z, rows):
        # re/im split once, leading dims collapsed into the sublane axis, (H, Wf)
        # flattened into the lane-dense frequency axis, zero-pad only to 128 lanes.
        s = jnp.stack([jnp.real(z), jnp.imag(z)], axis=0).astype(jnp.float32)
        s = s.reshape(2, rows, F)
        if pad:
            s = jnp.pad(s, ((0, 0), (0, 0), (0, pad)))
        return s

    x_s = prep(fft_x, B * Cin)                          # (2, B*Cin, Fp), rows (b, ci)
    k_s = prep(kernel_fft, Cout * Cin)                  # (2, Cout*Cin, Fp), rows (co, ci)

    grid = (Fp // f_tile,)

    x_spec = pl.BlockSpec((2, B * Cin, f_tile), lambda f: (0, 0, f))
    k_spec = pl.BlockSpec((2, Cout * Cin, f_tile), lambda f: (0, 0, f))
    o_spec = pl.BlockSpec((2, B * Cout, f_tile), lambda f: (0, 0, f))

    in_specs = [x_spec, k_spec]
    operands = [x_s, k_s]
    if use_mask:
        m_flat = mask.astype(jnp.float32).reshape(1, F)
        if pad:
            m_flat = jnp.pad(m_flat, ((0, 0), (0, pad)))
        in_specs.append(pl.BlockSpec((1, f_tile), lambda f: (0, f)))
        operands.append(m_flat)

    flops = 8 * B * Cout * Cin * F + (2 * B * Cin * F if use_mask else 0)
    bytes_accessed = 4 * (2 * B * Cin * Fp + 2 * Cout * Cin * Fp + 2 * B * Cout * Fp
                          + (Fp if use_mask else 0))

    # Explicit scoped-VMEM limit sized from the chosen tile + headroom, below capacity.
    est_bytes = bytes_per_lane * f_tile + (2 << 20)
    vmem_limit = int(min(max(2 * est_bytes, 32 * 1024 * 1024), cap - (8 << 20)))
    vmem_limit = max(vmem_limit, 16 * 1024 * 1024)

    out = pl.pallas_call(
        _make_fftconv_kernel(B, Cin, Cout, use_mask),
        out_shape=jax.ShapeDtypeStruct((2, B * Cout, Fp), jnp.float32),
        grid_spec=pltpu.PrefetchScalarGridSpec(
            num_scalar_prefetch=0,
            grid=grid,
            in_specs=in_specs,
            out_specs=o_spec),
        compiler_params=pltpu.CompilerParams(
            dimension_semantics=("parallel",),
            vmem_limit_bytes=vmem_limit),
        cost_estimate=pl.CostEstimate(flops=flops, transcendentals=0,
                                      bytes_accessed=bytes_accessed),
    )(*operands)

    out = out[:, :, :F].reshape(2, B, Cout, H, Wf)
    return out[0] + 1j * out[1]


# ------------------------------- JAX glue ------------------------------------
def make_fft_mask(height, width, fft_filter):
    """Reproduces FFTConvNet.fft_filter_def mask over the rfft half-spectrum."""
    wf = width // 2 + 1
    if fft_filter is None:
        return jnp.ones((height, wf), jnp.float32)
    cht, cwt = height // 2, width // 2
    fy = jnp.arange(height, dtype=jnp.float32)[:, None]
    fx = jnp.arange(wf, dtype=jnp.float32)[None, :]
    mask_area = jnp.sqrt((fx - cwt) ** 2 + (fy - cht) ** 2)
    mask_radius = 30.0
    if fft_filter == 'high':
        return (mask_area > mask_radius).astype(jnp.float32)
    return (mask_area <= mask_radius).astype(jnp.float32)


def fft_conv_net_forward(x, weight, bias, fft_filter=None):
    """Pallas-backed equivalent of FFTConvNet.forward (x: NCHW float)."""
    B, Cin, H, W = x.shape
    x = x.astype(jnp.float32)

    # TODO(synk): rfft2 / fftshift / irfft2 have no Pallas TPU primitive; done with jnp.fft.
    fft_x = jnp.fft.fftshift(jnp.fft.rfft2(x), axes=(-2, -1))       # (B, Cin, H, Wf) c64
    kernel_fft = jnp.fft.rfft2(weight, s=(H, W))                    # (Cout, Cin, H, Wf)

    mask = make_fft_mask(H, W, fft_filter) if fft_filter is not None else None

    fft_output = fft_complex_mul_sum(fft_x, kernel_fft, mask)       # (B, Cout, H, Wf) c64
    spatial_output = jnp.fft.irfft2(fft_output, s=(H, W))           # (B, Cout, H, W) f32
    if bias is not None:
        spatial_output = spatial_output + bias.reshape(1, -1, 1, 1)
    return spatial_output


def reference_forward(x, weight, bias, fft_filter=None):
    """Pure-JAX reference mirroring the PyTorch module exactly."""
    B, Cin, H, W = x.shape
    fft_x = jnp.fft.fftshift(jnp.fft.rfft2(x.astype(jnp.float32)), axes=(-2, -1))
    kernel_fft = jnp.fft.rfft2(weight, s=(H, W))
    if fft_filter is not None:
        fft_x = fft_x * make_fft_mask(H, W, fft_filter)
    fft_out = jnp.sum(fft_x[:, None] * kernel_fft[None], axis=2)
    out = jnp.fft.irfft2(fft_out, s=(H, W))
    if bias is not None:
        out = out + bias.reshape(1, -1, 1, 1)
    return out


# --------------------------------- main ---------------------------------------
if __name__ == "__main__":
    key = jax.random.PRNGKey(0)
    kx, kw, kb = jax.random.split(key, 3)

    # conv_layer ~ nn.Conv2d(4, 4, kernel_size=3, bias=True)
    B, Cin, Cout, H, W, KH, KW = 2, 4, 4, 16, 16, 3, 3
    x = jax.random.normal(kx, (B, Cin, H, W), dtype=jnp.float32)
    weight = 0.1 * jax.random.normal(kw, (Cout, Cin, KH, KW), dtype=jnp.float32)
    bias = 0.1 * jax.random.normal(kb, (Cout,), dtype=jnp.float32)

    for filt in ('low', 'high', None):   # exercise both masked and mask-free kernel variants
        out = fft_conv_net_forward(x, weight, bias, fft_filter=filt)
        out = jax.block_until_ready(out)
        ref = reference_forward(x, weight, bias, fft_filter=filt)
        assert out.shape == (B, Cout, H, W), out.shape
        assert out.dtype == jnp.float32
        err = float(jnp.max(jnp.abs(out - ref)))
        assert jnp.allclose(out, ref, atol=1e-2, rtol=1e-3), (filt, err)

    print("KERNEL_OK")
</pallas_src>

<mosaic_0001>
module attributes {stable_mosaic.version = 11 : i64} {
  func.func @kernel(%arg0: i32, %arg1: memref<2x8x256xf32, #tpu.memory_space<vmem>>, %arg2: memref<2x16x256xf32, #tpu.memory_space<vmem>>, %arg3: memref<1x256xf32, #tpu.memory_space<vmem>>, %arg4: memref<2x8x256xf32, #tpu.memory_space<vmem>>) attributes {dimension_semantics = [#tpu.dimension_semantics<parallel>], iteration_bounds = array<i64: 1>, scalar_prefetch = 0 : i64, scratch_operands = 0 : i64, tpu.core_type = #tpu.core_type<tc>, window_params = [{transform_indices = @transform_0, window_bounds = array<i64: 2, 8, 256>}, {transform_indices = @transform_1, window_bounds = array<i64: 2, 16, 256>}, {transform_indices = @transform_2, window_bounds = array<i64: 1, 256>}, {transform_indices = @transform_3, window_bounds = array<i64: 2, 8, 256>}]} {
    %c0 = arith.constant 0 : index
    %c0_0 = arith.constant 0 : index
    %c0_1 = arith.constant 0 : index
    %0 = vector.load %arg1[%c0, %c0_0, %c0_1] : memref<2x8x256xf32, #tpu.memory_space<vmem>>, vector<1x8x256xf32>
    %1 = vector.shape_cast %0 : vector<1x8x256xf32> to vector<8x256xf32>
    %c1 = arith.constant 1 : index
    %c0_2 = arith.constant 0 : index
    %c0_3 = arith.constant 0 : index
    %2 = vector.load %arg1[%c1, %c0_2, %c0_3] : memref<2x8x256xf32, #tpu.memory_space<vmem>>, vector<1x8x256xf32>
    %3 = vector.shape_cast %2 : vector<1x8x256xf32> to vector<8x256xf32>
    %c0_4 = arith.constant 0 : index
    %c0_5 = arith.constant 0 : index
    %4 = vector.load %arg3[%c0_4, %c0_5] : memref<1x256xf32, #tpu.memory_space<vmem>>, vector<1x256xf32>
    %5 = vector.broadcast %4 : vector<1x256xf32> to vector<8x256xf32>
    %6 = arith.mulf %1, %5 : vector<8x256xf32>
    %7 = vector.broadcast %4 : vector<1x256xf32> to vector<8x256xf32>
    %8 = arith.mulf %3, %7 : vector<8x256xf32>
    %9 = vector.shape_cast %6 : vector<8x256xf32> to vector<2x4x256xf32>
    %10 = vector.shape_cast %8 : vector<8x256xf32> to vector<2x4x256xf32>
    %c0_6 = arith.constant 0 : index
    %c0_7 = arith.constant 0 : index
    %c0_8 = arith.constant 0 : index
    %11 = vector.load %arg2[%c0_6, %c0_7, %c0_8] : memref<2x16x256xf32, #tpu.memory_space<vmem>>, vector<1x16x256xf32>
    %12 = vector.shape_cast %11 : vector<1x16x256xf32> to vector<16x256xf32>
    %13 = vector.shape_cast %12 : vector<16x256xf32> to vector<4x4x256xf32>
    %c1_9 = arith.constant 1 : index
    %c0_10 = arith.constant 0 : index
    %c0_11 = arith.constant 0 : index
    %14 = vector.load %arg2[%c1_9, %c0_10, %c0_11] : memref<2x16x256xf32, #tpu.memory_space<vmem>>, vector<1x16x256xf32>
    %15 = vector.shape_cast %14 : vector<1x16x256xf32> to vector<16x256xf32>
    %16 = vector.shape_cast %15 : vector<16x256xf32> to vector<4x4x256xf32>
    %17 = vector.extract_strided_slice %9 {offsets = [0, 0, 0], sizes = [1, 4, 256], strides = [1, 1, 1]} : vector<2x4x256xf32> to vector<1x4x256xf32>
    %18 = vector.shape_cast %17 : vector<1x4x256xf32> to vector<4x256xf32>
    %19 = vector.shape_cast %18 : vector<4x256xf32> to vector<1x4x256xf32>
    %20 = vector.extract_strided_slice %10 {offsets = [0, 0, 0], sizes = [1, 4, 256], strides = [1, 1, 1]} : vector<2x4x256xf32> to vector<1x4x256xf32>
    %21 = vector.shape_cast %20 : vector<1x4x256xf32> to vector<4x256xf32>
    %22 = vector.shape_cast %21 : vector<4x256xf32> to vector<1x4x256xf32>
    %23 = vector.broadcast %19 : vector<1x4x256xf32> to vector<4x4x256xf32>
    %24 = arith.mulf %23, %13 : vector<4x4x256xf32>
    %25 = vector.broadcast %22 : vector<1x4x256xf32> to vector<4x4x256xf32>
    %26 = arith.mulf %25, %16 : vector<4x4x256xf32>
    %27 = arith.subf %24, %26 : vector<4x4x256xf32>
    %28 = vector.broadcast %19 : vector<1x4x256xf32> to vector<4x4x256xf32>
    %29 = arith.mulf %28, %16 : vector<4x4x256xf32>
    %30 = vector.broadcast %22 : vector<1x4x256xf32> to vector<4x4x256xf32>
    %31 = arith.mulf %30, %13 : vector<4x4x256xf32>
    %32 = arith.addf %29, %31 : vector<4x4x256xf32>
    %cst = arith.constant dense<0.000000e+00> : vector<4x256xf32>
    %33 = vector.multi_reduction <add>, %27, %cst [1] : vector<4x4x256xf32> to vector<4x256xf32>
    %cst_12 = arith.constant dense<0.000000e+00> : vector<4x256xf32>
    %34 = vector.multi_reduction <add>, %32, %cst_12 [1] : vector<4x4x256xf32> to vector<4x256xf32>
    %c0_13 = arith.constant 0 : index
    %c0_14 = arith.constant 0 : index
    %c0_15 = arith.constant 0 : index
    %35 = vector.load %arg4[%c0_13, %c0_14, %c0_15] : memref<2x8x256xf32, #tpu.memory_space<vmem>>, vector<1x4x256xf32>
    %36 = vector.shape_cast %35 : vector<1x4x256xf32> to vector<4x256xf32>
    %37 = vector.shape_cast %33 : vector<4x256xf32> to vector<1x4x256xf32>
    tpu.vector_store %arg4[%c0_13, %c0_14, %c0_15], %37 {strides = array<i32>} : memref<2x8x256xf32, #tpu.memory_space<vmem>>, vector<1x4x256xf32>,
    %c1_16 = arith.constant 1 : index
    %c0_17 = arith.constant 0 : index
    %c0_18 = arith.constant 0 : index
    %38 = vector.load %arg4[%c1_16, %c0_17, %c0_18] : memref<2x8x256xf32, #tpu.memory_space<vmem>>, vector<1x4x256xf32>
    %39 = vector.shape_cast %38 : vector<1x4x256xf32> to vector<4x256xf32>
    %40 = vector.shape_cast %34 : vector<4x256xf32> to vector<1x4x256xf32>
    tpu.vector_store %arg4[%c1_16, %c0_17, %c0_18], %40 {strides = array<i32>} : memref<2x8x256xf32, #tpu.memory_space<vmem>>, vector<1x4x256xf32>,
    %41 = vector.extract_strided_slice %9 {offsets = [1, 0, 0], sizes = [1, 4, 256], strides = [1, 1, 1]} : vector<2x4x256xf32> to vector<1x4x256xf32>
    %42 = vector.shape_cast %41 : vector<1x4x256xf32> to vector<4x256xf32>
    %43 = vector.shape_cast %42 : vector<4x256xf32> to vector<1x4x256xf32>
    %44 = vector.extract_strided_slice %10 {offsets = [1, 0, 0], sizes = [1, 4, 256], strides = [1, 1, 1]} : vector<2x4x256xf32> to vector<1x4x256xf32>
    %45 = vector.shape_cast %44 : vector<1x4x256xf32> to vector<4x256xf32>
    %46 = vector.shape_cast %45 : vector<4x256xf32> to vector<1x4x256xf32>
    %47 = vector.broadcast %43 : vector<1x4x256xf32> to vector<4x4x256xf32>
    %48 = arith.mulf %47, %13 : vector<4x4x256xf32>
    %49 = vector.broadcast %46 : vector<1x4x256xf32> to vector<4x4x256xf32>
    %50 = arith.mulf %49, %16 : vector<4x4x256xf32>
    %51 = arith.subf %48, %50 : vector<4x4x256xf32>
    %52 = vector.broadcast %43 : vector<1x4x256xf32> to vector<4x4x256xf32>
    %53 = arith.mulf %52, %16 : vector<4x4x256xf32>
    %54 = vector.broadcast %46 : vector<1x4x256xf32> to vector<4x4x256xf32>
    %55 = arith.mulf %54, %13 : vector<4x4x256xf32>
    %56 = arith.addf %53, %55 : vector<4x4x256xf32>
    %cst_19 = arith.constant dense<0.000000e+00> : vector<4x256xf32>
    %57 = vector.multi_reduction <add>, %51, %cst_19 [1] : vector<4x4x256xf32> to vector<4x256xf32>
    %cst_20 = arith.constant dense<0.000000e+00> : vector<4x256xf32>
    %58 = vector.multi_reduction <add>, %56, %cst_20 [1] : vector<4x4x256xf32> to vector<4x256xf32>
    %c0_21 = arith.constant 0 : index
    %c4 = arith.constant 4 : index
    %c0_22 = arith.constant 0 : index
    %59 = vector.load %arg4[%c0_21, %c4, %c0_22] : memref<2x8x256xf32, #tpu.memory_space<vmem>>, vector<1x4x256xf32>
    %60 = vector.shape_cast %59 : vector<1x4x256xf32> to vector<4x256xf32>
    %61 = vector.shape_cast %57 : vector<4x256xf32> to vector<1x4x256xf32>
    tpu.vector_store %arg4[%c0_21, %c4, %c0_22], %61 {strides = array<i32>} : memref<2x8x256xf32, #tpu.memory_space<vmem>>, vector<1x4x256xf32>,
    %c1_23 = arith.constant 1 : index
    %c4_24 = arith.constant 4 : index
    %c0_25 = arith.constant 0 : index
    %62 = vector.load %arg4[%c1_23, %c4_24, %c0_25] : memref<2x8x256xf32, #tpu.memory_space<vmem>>, vector<1x4x256xf32>
    %63 = vector.shape_cast %62 : vector<1x4x256xf32> to vector<4x256xf32>
    %64 = vector.shape_cast %58 : vector<4x256xf32> to vector<1x4x256xf32>
    tpu.vector_store %arg4[%c1_23, %c4_24, %c0_25], %64 {strides = array<i32>} : memref<2x8x256xf32, #tpu.memory_space<vmem>>, vector<1x4x256xf32>,
    return
  }
  func.func @transform_0(%arg0: i32) -> (i32, i32, i32) {
    %c0_i32 = arith.constant 0 : i32
    %c0_i32_0 = arith.constant 0 : i32
    %c0_i32_1 = arith.constant 0 : i32
    return %c0_i32, %c0_i32_0, %arg0 : i32, i32, i32
  }
  func.func @transform_1(%arg0: i32) -> (i32, i32, i32) {
    %c0_i32 = arith.constant 0 : i32
    %c0_i32_0 = arith.constant 0 : i32
    %c0_i32_1 = arith.constant 0 : i32
    return %c0_i32, %c0_i32_0, %arg0 : i32, i32, i32
  }
  func.func @transform_2(%arg0: i32) -> (i32, i32) {
    %c0_i32 = arith.constant 0 : i32
    %c0_i32_0 = arith.constant 0 : i32
    return %c0_i32, %arg0 : i32, i32
  }
  func.func @transform_3(%arg0: i32) -> (i32, i32, i32) {
    %c0_i32 = arith.constant 0 : i32
    %c0_i32_0 = arith.constant 0 : i32
    %c0_i32_1 = arith.constant 0 : i32
    return %c0_i32, %c0_i32_0, %arg0 : i32, i32, i32
  }
}

</mosaic_0001>

<bundles_post_ra>
// kernel: tpu_custom_call.1
= control target key start
LH: loop header
LB: loop body
LE: loop exit
PB: predicated region body
PF: predicated region fallthrough
CT: control target
= control target key end

     0   :  { %8 = vsyncpa [#allocation3], 0  ;;  %s926_s0 = inlined_call_operand.hbm [shape: f32[2,8,256], index: 0, kind: input, shape index: {}]   ;;  %s927_s1 = inlined_call_operand.hbm [shape: f32[2,16,256], index: 1, kind: input, shape index: {}]   ;;  %s928_s2 = inlined_call_operand.hbm [shape: f32[1,256], index: 2, kind: input, shape index: {}]   ;;  %s929_s3 = inlined_call_operand.hbm [shape: f32[2,8,256], index: 3, kind: output, shape index: {}]  }
   0x1   :  { %9 = vsyncpa [#allocation6], 0 }
   0x2   :  { %10 = vsyncpa [#allocation4], 0  ;;  %s28_s14 = sshll.u32 %s927_s1, 4  ;;  %s720_s15 = smov [#allocation5]   ;;  %s29_s14 = int_to_ptr.hbm [resolvable:$true] %s28_s14 }
   0x3   :  { %s30_s16 = sshll.u32 %s720_s15, 4  ;;  %s15_s19 = sshll.u32 %s926_s0, 4  ;;  %s31_s16 = int_to_ptr.vmem [resolvable:$true] %s30_s16  ;;  %s16_s19 = int_to_ptr.hbm [resolvable:$true] %s15_s19 }
   0x4   :  { %s721_s20 = smov 256   ;;  %s722_s21 = smov 16  }
   0x5   :  { %36 = dma.hbm_to_vmem [thread:$0]  %s29_s14, 1024, %s31_s16, [#allocation6], %s721_s20, %s721_s20, %s722_s21  }
   0x6   :  { %s723_s22 = smov [#allocation2]   ;;  %s42_s1 = sshll.u32 %s928_s2, 4  ;;  %s43_s1 = int_to_ptr.hbm [resolvable:$true] %s42_s1 }
   0x7   :  { %s17_s23 = sshll.u32 %s723_s22, 4  ;;  %s724_s0 = smov [#allocation7]   ;;  %s18_s23 = int_to_ptr.vmem [resolvable:$true] %s17_s23 }
   0x8   :  { %23 = dma.hbm_to_vmem [thread:$0]  %s16_s19, 512, %s18_s23, [#allocation3], %s721_s20, %s721_s20, %s722_s21  }
   0x9   :  { %s44_s26 = sshll.u32 %s724_s0, 4  ;;  %s45_s26 = int_to_ptr.vmem [resolvable:$true] %s44_s26 }
   0xa   :  { %47 = dma.hbm_to_vmem [thread:$0]  %s43_s1, 32, %s45_s26, [#allocation6]  }
   0xb   :  { %714 = dma.done.wait [#allocation3], 512  }
   0xc   :  { %715 = vsyncadd [#allocation3], 4294966784 }
   0xd   :  { %716 = dma.done.wait [#allocation6], 1056  }
   0xe   :  { %717 = vsyncadd [#allocation6], 4294966240  ;;  %v60_v0 = vld [vmem:[#allocation2] sm:$0xff]  ;;  %v61_v1 = vld [vmem:[#allocation2 + $0x8] sm:$0xff]  ;;  %vm78_vm0 = vcmask 1043456   ;;  %vm331_vm1 = vcmask 1041409  }
   0xf   :  { %v63_v2 = vld [vmem:[#allocation2 + $0x10] sm:$0xff]  ;;  %v64_v3 = vld [vmem:[#allocation2 + $0x18] sm:$0xff]  ;;  %v65_v4 = vld [vmem:[#allocation7] sm:$0x3]  ;;  %vm333_vm2 = vcmask 1042434   ;;  %vm335_vm3 = vcmask 1043459  }
  0x10   :  { %v92_v5 = vld [vmem:[#allocation5] sm:$0xff]  ;;  %v67_v6 = vperm.slane %v65_v4, 0  ;;  %v68_v7 = vperm.slane %v65_v4, 1  ;;  %v93_v8 = vld [vmem:[#allocation5 + $0x8] sm:$0xff]  ;;  %v95_v29 = vld [vmem:[#allocation5 + $0x18] sm:$0xff]  ;;  %vm561_vm4 = vcmask 1045509  }
  0x11   :  { %v113_v9 = vld [vmem:[#allocation5 + $0x20] sm:$0xff]  ;;  %v114_v10 = vld [vmem:[#allocation5 + $0x28] sm:$0xff]  ;;  %v100_v11 = vrot.slane %v93_v8, 4  ;;  %v116_v34 = vld [vmem:[#allocation5 + $0x38] sm:$0xff]  ;;  %v101_v38 = vrot.slane %v95_v29, 4  ;;  %vm563_vm5 = vcmask 1046534  }
  0x12   :  { %v121_v12 = vrot.slane %v114_v10, 4  ;;  %v71_v13 = vmul.f32 %v67_v6, %v60_v0  ;;  %v72_v14 = vmul.f32 %v68_v7, %v61_v1  ;;  %v73_v15 = vmul.f32 %v67_v6, %v63_v2  ;;  %v94_v42 = vld [vmem:[#allocation5 + $0x10] sm:$0xff]  ;;  %s725_s2 = smov [#allocation8]   ;;  %s598_s30 = sshll.u32 %s929_s3, 4  ;;  %s599_s30 = int_to_ptr.hbm [resolvable:$true] %s598_s30 }
  0x13   :  { %v74_v16 = vmul.f32 %v68_v7, %v64_v3  ;;  %v102_v17 = vsel %vm78_vm0, %v92_v5, %v100_v11  ;;  %v103_v19 = vsel %vm78_vm0, %v100_v11, %v92_v5  ;;  %v122_v43 = vrot.slane %v116_v34, 4  ;;  %v115_v47 = vld [vmem:[#allocation5 + $0x30] sm:$0xff]  ;;  %s596_s27 = sshll.u32 %s725_s2, 4  ;;  %s597_s27 = int_to_ptr.vmem [resolvable:$true] %s596_s27 }
  0x14   :  { %v123_v18 = vsel %vm78_vm0, %v113_v9, %v121_v12  ;;  %v124_v20 = vsel %vm78_vm0, %v121_v12, %v113_v9  ;;  %v77_v21 = vrot.slane %v72_v14, 4  ;;  %v104_v23 = vrot.slane %v103_v19, 4 }
  0x15   :  { %v86_v22 = vrot.slane %v74_v16, 4  ;;  %v125_v24 = vrot.slane %v124_v20, 4  ;;  %v105_v46 = vsel %vm78_vm0, %v94_v42, %v101_v38  ;;  %v126_v48 = vsel %vm78_vm0, %v115_v47, %v122_v43 }
  0x16   :  { %v766_v25 = vsel %vm78_vm0, %v71_v13, %v77_v21  ;;  %v80_v26 = vsel %vm78_vm0, %v77_v21, %v71_v13  ;;  %v106_v57 = vsel %vm78_vm0, %v101_v38, %v94_v42  ;;  %v127_v58 = vsel %vm78_vm0, %v122_v43, %v115_v47 }
  0x17   :  { %v770_v27 = vsel %vm78_vm0, %v73_v15, %v86_v22  ;;  %v88_v28 = vsel %vm78_vm0, %v86_v22, %v73_v15  ;;  %v773_v30 = vrot.slane %v80_v26, 4  ;;  %v133_v32 = vmul.f32 %v102_v17, %v766_v25 }
  0x18   :  { %v775_v31 = vrot.slane %v88_v28, 4  ;;  %v137_v33 = vmul.f32 %v123_v18, %v770_v27  ;;  %v134_v35 = vmul.f32 %v104_v23, %v766_v25  ;;  %v138_v36 = vmul.f32 %v125_v24, %v770_v27 }
  0x19   :  { %v782_v39 = vmul.f32 %v102_v17, %v773_v30  ;;  %v145_v44 = vmul.f32 %v123_v18, %v766_v25  ;;  %v149_v45 = vmul.f32 %v102_v17, %v770_v27  ;;  %v135_v49 = vmul.f32 %v105_v46, %v766_v25 }
  0x1a   :  { %v141_v37 = vsub.f32 %v133_v32, %v137_v33  ;;  %v785_v40 = vmul.f32 %v123_v18, %v775_v31  ;;  %v142_v41 = vsub.f32 %v134_v35, %v138_v36  ;;  %v375_v50 = vmul.f32 %v123_v18, %v773_v30 }
  0x1b   :  { %v139_v51 = vmul.f32 %v126_v48, %v770_v27  ;;  %v379_v53 = vmul.f32 %v102_v17, %v775_v31  ;;  %v798_v54 = vmul.f32 %v104_v23, %v773_v30  ;;  %v801_v55 = vmul.f32 %v125_v24, %v775_v31 }
  0x1c   :  { %161 = vst [vmem:[#allocation1] ss:$2 sm:$0xff] %v141_v37  ;;  %v371_v52 = vsub.f32 %v782_v39, %v785_v40  ;;  %v153_v59 = vadd.f32 %v149_v45, %v145_v44  ;;  %v376_v60 = vmul.f32 %v125_v24, %v773_v30  ;;  %v380_v61 = vmul.f32 %v104_v23, %v775_v31 }
  0x1d   :  { %165 = vst [vmem:[#allocation1 + $0x10] ss:$2 sm:$0xff] %v142_v41  ;;  %v143_v56 = vsub.f32 %v135_v49, %v139_v51  ;;  %v107_v62 = vrot.slane %v106_v57, 4  ;;  %v128_v63 = vrot.slane %v127_v58, 4  ;;  %v147_v0 = vmul.f32 %v126_v48, %v766_v25 }
  0x1e   :  { %v151_v1 = vmul.f32 %v105_v46, %v770_v27  ;;  %v146_v2 = vmul.f32 %v125_v24, %v766_v25  ;;  %v150_v3 = vmul.f32 %v104_v23, %v770_v27  ;;  %v811_v4 = vadd.f32 %v379_v53, %v375_v50 }
  0x1f   :  { %169 = vst [vmem:[#allocation1 + $0x20] ss:$2 sm:$0xff] %v143_v56  ;;  %v814_v5 = vmul.f32 %v105_v46, %v773_v30  ;;  %v136_v6 = vmul.f32 %v107_v62, %v766_v25  ;;  %v140_v7 = vmul.f32 %v128_v63, %v770_v27  ;;  %v819_v10 = vmul.f32 %v126_v48, %v775_v31 }
  0x20   :  { %v377_v11 = vmul.f32 %v126_v48, %v773_v30  ;;  %v381_v14 = vmul.f32 %v105_v46, %v775_v31  ;;  %v154_v19 = vadd.f32 %v150_v3, %v146_v2  ;;  %v155_v22 = vadd.f32 %v151_v1, %v147_v0 }
  0x21   :  { %v144_v15 = vsub.f32 %v136_v6, %v140_v7  ;;  %v148_v23 = vmul.f32 %v128_v63, %v766_v25  ;;  %v372_v32 = vsub.f32 %v798_v54, %v801_v55  ;;  %v830_v33 = vadd.f32 %v380_v61, %v376_v60 }
  0x22   :  { %v152_v35 = vmul.f32 %v107_v62, %v770_v27  ;;  %v373_v36 = vsub.f32 %v814_v5, %v819_v10  ;;  %v835_v37 = vadd.f32 %v381_v14, %v377_v11  ;;  %v366_v50 = vmul.f32 %v107_v62, %v773_v30 }
  0x23   :  { %v162_v8 = vld.sshfl [vmem:[#allocation1] sm:$0xff pattern:$0x75316420]  ;;  %v163_v9 = vld.sshfl [vmem:[#allocation1 + $0x8] sm:$0xff pattern:$0x75316420]  ;;  %v370_v51 = vmul.f32 %v128_v63, %v775_v31  ;;  %v378_v56 = vmul.f32 %v128_v63, %v773_v30  ;;  %v382_v57 = vmul.f32 %v107_v62, %v775_v31 }
  0x24   :  { %v184_v12 = vsel %vm78_vm0, %v162_v8, 0.0  ;;  %v191_v13 = vsel %vm78_vm0, %v163_v9, 0.0  ;;  %244 = vst [vmem:[#allocation1] ss:$2 sm:$0xff] %v153_v59  ;;  %v156_v46 = vadd.f32 %v152_v35, %v148_v23  ;;  %vm565_vm6 = vcmask 1047559  }
  0x25   :  { %v185_v16 = vrot.slane %v184_v12, 4  ;;  %v192_v17 = vrot.slane %v191_v13, 4  ;;  %v166_v18 = vld.sshfl [vmem:[#allocation1 + $0x10] sm:$0xff pattern:$0x75316420] }
  0x26   :  { %v167_v20 = vld.sshfl [vmem:[#allocation1 + $0x18] sm:$0xff pattern:$0x75316420]  ;;  %v198_v21 = vsel %vm78_vm0, %v166_v18, 0.0  ;;  %173 = vst [vmem:[#allocation1 + $0x30] ss:$2 sm:$0xff] %v144_v15 }
  0x27   :  { %v186_v24 = vadd.f32 %v185_v16, %v184_v12  ;;  %v193_v26 = vadd.f32 %v192_v17, %v191_v13  ;;  %v199_v28 = vrot.slane %v198_v21, 4  ;;  %v205_v29 = vsel %vm78_vm0, %v167_v20, 0.0  ;;  %248 = vst [vmem:[#allocation1 + $0x10] ss:$2 sm:$0xff] %v154_v19 }
  0x28   :  { %v206_v34 = vrot.slane %v205_v29, 4  ;;  %v170_v41 = vld.sshfl [vmem:[#allocation1 + $0x20] sm:$0xff pattern:$0x75316420]  ;;  %v374_v12 = vsub.f32 %v366_v50, %v370_v51  ;;  %v850_v13 = vadd.f32 %v382_v57, %v378_v56 }
  0x29   :  { %v187_v25 = vrot.slane %v186_v24, 2  ;;  %v200_v38 = vadd.f32 %v199_v28, %v198_v21  ;;  %v194_v42 = vrot.slane %v193_v26, 2  ;;  %v171_v44 = vld.sshfl [vmem:[#allocation1 + $0x28] sm:$0xff pattern:$0x75316420]  ;;  %v212_v45 = vsel %vm78_vm0, %v170_v41, 0.0 }
  0x2a   :  { %v207_v43 = vadd.f32 %v206_v34, %v205_v29  ;;  %v213_v48 = vrot.slane %v212_v45, 4  ;;  %v219_v49 = vsel %vm78_vm0, %v171_v44, 0.0  ;;  %252 = vst [vmem:[#allocation1 + $0x20] ss:$2 sm:$0xff] %v155_v22 }
  0x2b   :  { %v201_v47 = vrot.slane %v200_v38, 2  ;;  %v188_v27 = vadd.f32 %v187_v25, %v186_v24  ;;  %v220_v54 = vrot.slane %v219_v49, 4  ;;  %v245_v55 = vld.sshfl [vmem:[#allocation1] sm:$0xff pattern:$0x75316420]  ;;  %v195_v6 = vadd.f32 %v194_v42, %v193_v26 }
  0x2c   :  { %v208_v53 = vrot.slane %v207_v43, 2  ;;  %v246_v58 = vld.sshfl [vmem:[#allocation1 + $0x8] sm:$0xff pattern:$0x75316420]  ;;  %v267_v59 = vsel %vm78_vm0, %v245_v55, 0.0  ;;  %v214_v61 = vadd.f32 %v213_v48, %v212_v45 }
  0x2d   :  { %v189_v60 = vrot.slane %v188_v27, 1  ;;  %v221_v0 = vadd.f32 %v220_v54, %v219_v49  ;;  %v174_v1 = vld.sshfl [vmem:[#allocation1 + $0x30] sm:$0xff pattern:$0x75316420]  ;;  %v202_v3 = vadd.f32 %v201_v47, %v200_v38  ;;  %v268_v9 = vrot.slane %v267_v59, 4 }
  0x2e   :  { %v175_v2 = vld.sshfl [vmem:[#allocation1 + $0x38] sm:$0xff pattern:$0x75316420]  ;;  %v226_v7 = vsel %vm78_vm0, %v174_v1, 0.0  ;;  %v274_v30 = vsel %vm78_vm0, %v246_v58, 0.0  ;;  %v209_v11 = vadd.f32 %v208_v53, %v207_v43  ;;  %v215_v21 = vrot.slane %v214_v61, 2 }
  0x2f   :  { %v233_v8 = vsel %vm78_vm0, %v175_v2, 0.0  ;;  %256 = vst [vmem:[#allocation1 + $0x30] ss:$2 sm:$0xff] %v156_v46  ;;  %v227_v63 = vrot.slane %v226_v7, 4  ;;  %v275_v62 = vrot.slane %v274_v30, 4  ;;  %v190_v16 = vadd.f32 %v189_v60, %v188_v27 }
  0x30   :  { %v234_v31 = vrot.slane %v233_v8, 4  ;;  %391 = vst [vmem:[#allocation1] ss:$2 sm:$0xff] %v371_v52  ;;  %v249_v14 = vld.sshfl [vmem:[#allocation1 + $0x10] sm:$0xff pattern:$0x75316420]  ;;  %v269_v17 = vadd.f32 %v268_v9, %v267_v59  ;;  %v216_v28 = vadd.f32 %v215_v21, %v214_v61 }
  0x31   :  { %v250_v15 = vld.sshfl [vmem:[#allocation1 + $0x18] sm:$0xff pattern:$0x75316420]  ;;  %v281_v18 = vsel %vm78_vm0, %v249_v14, 0.0  ;;  %v203_v20 = vrot.slane %v202_v3, 1  ;;  %v228_v52 = vadd.f32 %v227_v63, %v226_v7  ;;  %v196_v23 = vrot.slane %v195_v6, 1 }
  0x32   :  { %v288_v19 = vsel %vm78_vm0, %v250_v15, 0.0  ;;  %395 = vst [vmem:[#allocation1 + $0x10] ss:$2 sm:$0xff] %v372_v32  ;;  %v282_v22 = vrot.slane %v281_v18, 4  ;;  %v210_v29 = vrot.slane %v209_v11, 1  ;;  %v222_v34 = vrot.slane %v221_v0, 2 }
  0x33   :  { %v289_v39 = vrot.slane %v288_v19, 4  ;;  %v253_v40 = vld.sshfl [vmem:[#allocation1 + $0x20] sm:$0xff pattern:$0x75316420]  ;;  %v204_v26 = vadd.f32 %v203_v20, %v202_v3  ;;  %v229_v35 = vrot.slane %v228_v52, 2  ;;  %v197_v32 = vadd.f32 %v196_v23, %v195_v6 }
  0x34   :  { %v854_v24 = vld.sshfl [vmem:[#allocation1 + $0x28] sm:$0xff pattern:$0x75316420]  ;;  %v235_v25 = vadd.f32 %v234_v31, %v233_v8  ;;  %v270_v38 = vrot.slane %v269_v17, 2  ;;  %v211_v44 = vadd.f32 %v210_v29, %v209_v11  ;;  %v223_v45 = vadd.f32 %v222_v34, %v221_v0 }
  0x35   :  { %399 = vst [vmem:[#allocation1 + $0x20] ss:$2 sm:$0xff] %v373_v36  ;;  %v332_v43 = vsel %vm331_vm1, %v204_v26, %v190_v16  ;;  %v283_v46 = vadd.f32 %v282_v22, %v281_v18  ;;  %v217_v47 = vrot.slane %v216_v28, 1  ;;  %v230_v48 = vadd.f32 %v229_v35, %v228_v52 }
  0x36   :  { %v257_v41 = vld.sshfl [vmem:[#allocation1 + $0x30] sm:$0xff pattern:$0x75316420]  ;;  %v258_v42 = vld.sshfl [vmem:[#allocation1 + $0x38] sm:$0xff pattern:$0x75316420]  ;;  %v271_v27 = vadd.f32 %v270_v38, %v269_v17  ;;  %v337_v5 = vsel %vm331_vm1, %v211_v44, %v197_v32  ;;  %v276_v0 = vadd.f32 %v275_v62, %v274_v30  ;;  %v290_v11 = vadd.f32 %v289_v39, %v288_v19 }
  0x37   :  { %403 = vst [vmem:[#allocation1 + $0x30] ss:$2 sm:$0xff] %v374_v12  ;;  %v236_v49 = vrot.slane %v235_v25, 2  ;;  %v224_v50 = vrot.slane %v223_v45, 1  ;;  %v284_v36 = vrot.slane %v283_v46, 2  ;;  %v295_v51 = vsel %vm78_vm0, %v253_v40, 0.0 }
  0x38   :  { %v392_v10 = vld.sshfl [vmem:[#allocation1] sm:$0xff pattern:$0x75316420]  ;;  %v218_v53 = vadd.f32 %v217_v47, %v216_v28  ;;  %v231_v54 = vrot.slane %v230_v48, 1  ;;  %v272_v57 = vrot.slane %v271_v27, 1  ;;  %v296_v61 = vrot.slane %v295_v51, 4 }
  0x39   :  { %v237_v55 = vadd.f32 %v236_v49, %v235_v25  ;;  %v862_v56 = vld.sshfl [vmem:[#allocation1 + $0x8] sm:$0xff pattern:$0x75316420]  ;;  %v225_v58 = vadd.f32 %v224_v50, %v223_v45  ;;  %v396_v59 = vld.sshfl [vmem:[#allocation1 + $0x10] sm:$0xff pattern:$0x75316420]  ;;  %v285_v60 = vadd.f32 %v284_v36, %v283_v46 }
  0x3a   :  { %474 = vst [vmem:[#allocation1] ss:$2 sm:$0xff] %v811_v4  ;;  %v232_v1 = vadd.f32 %v231_v54, %v230_v48  ;;  %v334_v2 = vsel %vm333_vm2, %v218_v53, %v332_v43  ;;  %v866_v6 = vld.sshfl [vmem:[#allocation1 + $0x18] sm:$0xff pattern:$0x75316420]  ;;  %v273_v7 = vadd.f32 %v272_v57, %v271_v27  ;;  %v297_v31 = vadd.f32 %v296_v61, %v295_v51 }
  0x3b   :  { %v238_v3 = vrot.slane %v237_v55, 1  ;;  %v338_v8 = vsel %vm333_vm2, %v225_v58, %v337_v5  ;;  %478 = vst [vmem:[#allocation1 + $0x10] ss:$2 sm:$0xff] %v830_v33  ;;  %v286_v63 = vrot.slane %v285_v60, 1  ;;  %v309_v30 = vsel %vm78_vm0, %v257_v41, 0.0 }
  0x3c   :  { %v400_v9 = vld.sshfl [vmem:[#allocation1 + $0x20] sm:$0xff pattern:$0x75316420]  ;;  %v336_v4 = vsel %vm335_vm3, %v232_v1, %v334_v2  ;;  %v871_v14 = vld.sshfl [vmem:[#allocation1 + $0x28] sm:$0xff pattern:$0x75316420] }
  0x3d   :  { %v239_v12 = vadd.f32 %v238_v3, %v237_v55  ;;  %v277_v62 = vrot.slane %v276_v0, 2  ;;  %342 = vst [vmem:[#allocation8] sm:$0xf] %v336_v4  ;;  %v287_v16 = vadd.f32 %v286_v63, %v285_v60  ;;  %v298_v17 = vrot.slane %v297_v31, 2 }
  0x3e   :  { %v404_v15 = vld.sshfl [vmem:[#allocation1 + $0x30] sm:$0xff pattern:$0x75316420]  ;;  %482 = vst [vmem:[#allocation1 + $0x20] ss:$2 sm:$0xff] %v835_v37  ;;  %v310_v20 = vrot.slane %v309_v30, 4 }
  0x3f   :  { %v339_v18 = vsel %vm335_vm3, %v239_v12, %v338_v8  ;;  %v876_v33 = vld.sshfl [vmem:[#allocation1 + $0x38] sm:$0xff pattern:$0x75316420]  ;;  %v278_v19 = vadd.f32 %v277_v62, %v276_v0  ;;  %v299_v21 = vadd.f32 %v298_v17, %v297_v31  ;;  %v352_v22 = vsel %vm331_vm1, %v287_v16, %v273_v7 }
  0x40   :  { %343 = vst [vmem:[#allocation8 + $0x8] sm:$0xf] %v339_v18  ;;  %v291_v39 = vrot.slane %v290_v11, 2  ;;  %v302_v40 = vsel %vm78_vm0, %v854_v24, 0.0  ;;  %v311_v52 = vadd.f32 %v310_v20, %v309_v30  ;;  %v316_v28 = vsel %vm78_vm0, %v258_v42, 0.0 }
  0x41   :  { %486 = vst [vmem:[#allocation1 + $0x30] ss:$2 sm:$0xff] %v850_v13  ;;  %v279_v23 = vrot.slane %v278_v19, 1  ;;  %v303_v26 = vrot.slane %v302_v40, 4  ;;  %v300_v37 = vrot.slane %v299_v21, 1  ;;  %v317_v34 = vrot.slane %v316_v28, 4 }
  0x42   :  { %v292_v29 = vadd.f32 %v291_v39, %v290_v11  ;;  %v414_v35 = vsel %vm78_vm0, %v392_v10, 0.0  ;;  %v312_v32 = vrot.slane %v311_v52, 2  ;;  %v428_v24 = vsel %vm78_vm0, %v396_v59, 0.0  ;;  %v475_v18 = vld.sshfl [vmem:[#allocation1] sm:$0xff pattern:$0x75316420] }
  0x43   :  { %v280_v25 = vadd.f32 %v279_v23, %v278_v19  ;;  %v304_v38 = vadd.f32 %v303_v26, %v302_v40  ;;  %v415_v41 = vrot.slane %v414_v35, 4  ;;  %v301_v43 = vadd.f32 %v300_v37, %v299_v21  ;;  %v479_v26 = vld.sshfl [vmem:[#allocation1 + $0x10] sm:$0xff pattern:$0x75316420] }
  0x44   :  { %v293_v44 = vrot.slane %v292_v29, 1  ;;  %v318_v45 = vadd.f32 %v317_v34, %v316_v28  ;;  %v313_v13 = vadd.f32 %v312_v32, %v311_v52  ;;  %v429_v48 = vrot.slane %v428_v24, 4 }
  0x45   :  { %v305_v46 = vrot.slane %v304_v38, 2  ;;  %v416_v47 = vadd.f32 %v415_v41, %v414_v35  ;;  %v353_v42 = vsel %vm333_vm2, %v301_v43, %v352_v22  ;;  %v442_v50 = vsel %vm78_vm0, %v400_v9, 0.0 }
  0x46   :  { %v294_v49 = vadd.f32 %v293_v44, %v292_v29  ;;  %v319_v27 = vrot.slane %v318_v45, 2  ;;  %v314_v5 = vrot.slane %v313_v13, 1  ;;  %v430_v51 = vadd.f32 %v429_v48, %v428_v24 }
  0x47   :  { %v306_v10 = vadd.f32 %v305_v46, %v304_v38  ;;  %v417_v36 = vrot.slane %v416_v47, 2  ;;  %v443_v55 = vrot.slane %v442_v50, 4  ;;  %v456_v57 = vsel %vm78_vm0, %v404_v15, 0.0 }
  0x48   :  { %v320_v53 = vadd.f32 %v319_v27, %v318_v45  ;;  %v355_v54 = vsel %vm331_vm1, %v294_v49, %v280_v25  ;;  %v315_v58 = vadd.f32 %v314_v5, %v313_v13  ;;  %v431_v61 = vrot.slane %v430_v51, 2  ;;  %v483_v25 = vld.sshfl [vmem:[#allocation1 + $0x20] sm:$0xff pattern:$0x75316420] }
  0x49   :  { %v307_v59 = vrot.slane %v306_v10, 1  ;;  %v418_v60 = vadd.f32 %v417_v36, %v416_v47  ;;  %v444_v1 = vadd.f32 %v443_v55, %v442_v50  ;;  %v457_v2 = vrot.slane %v456_v57, 4 }
  0x4a   :  { %v321_v0 = vrot.slane %v320_v53, 1  ;;  %v354_v3 = vsel %vm335_vm3, %v315_v58, %v353_v42  ;;  %v432_v9 = vadd.f32 %v431_v61, %v430_v51  ;;  %v421_v17 = vsel %vm78_vm0, %v862_v56, 0.0 }
  0x4b   :  { %v308_v7 = vadd.f32 %v307_v59, %v306_v10  ;;  %v419_v8 = vrot.slane %v418_v60, 1  ;;  %361 = vst [vmem:[#allocation8 + $0x10] sm:$0xf] %v354_v3  ;;  %v445_v31 = vrot.slane %v444_v1, 2  ;;  %v458_v11 = vadd.f32 %v457_v2, %v456_v57 }
  0x4c   :  { %v322_v63 = vadd.f32 %v321_v0, %v320_v53  ;;  %v433_v30 = vrot.slane %v432_v9, 1  ;;  %v422_v19 = vrot.slane %v421_v17, 4  ;;  %v435_v21 = vsel %vm78_vm0, %v866_v6, 0.0  ;;  %v476_v10 = vld.sshfl [vmem:[#allocation1 + $0x8] sm:$0xff pattern:$0x75316420] }
  0x4d   :  { %v356_v4 = vsel %vm333_vm2, %v308_v7, %v355_v54  ;;  %v420_v12 = vadd.f32 %v419_v8, %v418_v60  ;;  %v446_v15 = vadd.f32 %v445_v31, %v444_v1  ;;  %v459_v16 = vrot.slane %v458_v11, 2 }
  0x4e   :  { %v357_v62 = vsel %vm335_vm3, %v322_v63, %v356_v4  ;;  %v434_v20 = vadd.f32 %v433_v30, %v432_v9  ;;  %v449_v22 = vsel %vm78_vm0, %v871_v14, 0.0  ;;  %v436_v52 = vrot.slane %v435_v21, 4 }
  0x4f   :  { %362 = vst [vmem:[#allocation8 + $0x18] sm:$0xf] %v357_v62  ;;  %v447_v39 = vrot.slane %v446_v15, 1  ;;  %v460_v40 = vadd.f32 %v459_v16, %v458_v11  ;;  %v450_v23 = vrot.slane %v449_v22, 4  ;;  %v423_v37 = vadd.f32 %v422_v19, %v421_v17 }
  0x50   :  { %v562_v28 = vsel %vm561_vm4, %v434_v20, %v420_v12  ;;  %v463_v56 = vsel %vm78_vm0, %v876_v33, 0.0  ;;  %v497_v29 = vsel %vm78_vm0, %v475_v18, 0.0  ;;  %v437_v32 = vadd.f32 %v436_v52, %v435_v21  ;;  %v487_v33 = vld.sshfl [vmem:[#allocation1 + $0x30] sm:$0xff pattern:$0x75316420] }
  0x51   :  { %v448_v34 = vadd.f32 %v447_v39, %v446_v15  ;;  %v461_v35 = vrot.slane %v460_v40, 1  ;;  %v451_v6 = vadd.f32 %v450_v23, %v449_v22  ;;  %v424_v38 = vrot.slane %v423_v37, 2  ;;  %v480_v11 = vld.sshfl [vmem:[#allocation1 + $0x18] sm:$0xff pattern:$0x75316420] }
  0x52   :  { %v464_v14 = vrot.slane %v463_v56, 4  ;;  %v498_v41 = vrot.slane %v497_v29, 4  ;;  %v511_v43 = vsel %vm78_vm0, %v479_v26, 0.0  ;;  %v438_v24 = vrot.slane %v437_v32, 2 }
  0x53   :  { %v462_v44 = vadd.f32 %v461_v35, %v460_v40  ;;  %v564_v45 = vsel %vm563_vm5, %v448_v34, %v562_v28  ;;  %v452_v13 = vrot.slane %v451_v6, 2  ;;  %v425_v46 = vadd.f32 %v424_v38, %v423_v37  ;;  %v484_v15 = vld.sshfl [vmem:[#allocation1 + $0x28] sm:$0xff pattern:$0x75316420] }
  0x54   :  { %v465_v47 = vadd.f32 %v464_v14, %v463_v56  ;;  %v499_v48 = vadd.f32 %v498_v41, %v497_v29  ;;  %v512_v42 = vrot.slane %v511_v43, 4  ;;  %v439_v27 = vadd.f32 %v438_v24, %v437_v32  ;;  %v488_v39 = vld.sshfl [vmem:[#allocation1 + $0x38] sm:$0xff pattern:$0x75316420] }
  0x55   :  { %v566_v49 = vsel %vm565_vm6, %v462_v44, %v564_v45  ;;  %v453_v50 = vadd.f32 %v452_v13, %v451_v6  ;;  %v525_v5 = vsel %vm78_vm0, %v483_v25, 0.0  ;;  %v426_v36 = vrot.slane %v425_v46, 1 }
  0x56   :  { %572 = vst [vmem:[#allocation8] sm:$0xf0] %v566_v49  ;;  %v466_v51 = vrot.slane %v465_v47, 2  ;;  %v500_v53 = vrot.slane %v499_v48, 2  ;;  %v513_v54 = vadd.f32 %v512_v42, %v511_v43  ;;  %v440_v55 = vrot.slane %v439_v27, 1 }
  0x57   :  { %v454_v57 = vrot.slane %v453_v50, 1  ;;  %v526_v58 = vrot.slane %v525_v5, 4  ;;  %v539_v59 = vsel %vm78_vm0, %v487_v33, 0.0  ;;  %v427_v60 = vadd.f32 %v426_v36, %v425_v46 }
  0x58   :  { %v467_v61 = vadd.f32 %v466_v51, %v465_v47  ;;  %v501_v0 = vadd.f32 %v500_v53, %v499_v48  ;;  %v514_v1 = vrot.slane %v513_v54, 2  ;;  %v441_v2 = vadd.f32 %v440_v55, %v439_v27 }
  0x59   :  { %v455_v3 = vadd.f32 %v454_v57, %v453_v50  ;;  %v527_v7 = vadd.f32 %v526_v58, %v525_v5  ;;  %v540_v8 = vrot.slane %v539_v59, 4  ;;  %v504_v4 = vsel %vm78_vm0, %v476_v10, 0.0 }
  0x5a   :  { %v468_v9 = vrot.slane %v467_v61, 1  ;;  %v502_v63 = vrot.slane %v501_v0, 1  ;;  %v515_v31 = vadd.f32 %v514_v1, %v513_v54  ;;  %v567_v12 = vsel %vm561_vm4, %v441_v2, %v427_v60 }
  0x5b   :  { %v528_v30 = vrot.slane %v527_v7, 2  ;;  %v541_v62 = vadd.f32 %v540_v8, %v539_v59  ;;  %v505_v16 = vrot.slane %v504_v4, 4  ;;  %v568_v18 = vsel %vm563_vm5, %v455_v3, %v567_v12 }
  0x5c   :  { %v469_v17 = vadd.f32 %v468_v9, %v467_v61  ;;  %v503_v20 = vadd.f32 %v502_v63, %v501_v0  ;;  %v516_v19 = vrot.slane %v515_v31, 1  ;;  %v518_v52 = vsel %vm78_vm0, %v480_v11, 0.0 }
  0x5d   :  { %v529_v21 = vadd.f32 %v528_v30, %v527_v7  ;;  %v542_v22 = vrot.slane %v541_v62, 2  ;;  %v506_v40 = vadd.f32 %v505_v16, %v504_v4  ;;  %v519_v28 = vrot.slane %v518_v52, 4 }
  0x5e   :  { %v569_v23 = vsel %vm565_vm6, %v469_v17, %v568_v18  ;;  %v517_v26 = vadd.f32 %v516_v19, %v515_v31  ;;  %v532_v37 = vsel %vm78_vm0, %v484_v15, 0.0  ;;  %v546_v25 = vsel %vm78_vm0, %v488_v39, 0.0 }
  0x5f   :  { %573 = vst [vmem:[#allocation8 + $0x8] sm:$0xf0] %v569_v23  ;;  %v530_v56 = vrot.slane %v529_v21, 1  ;;  %v543_v29 = vadd.f32 %v542_v22, %v541_v62  ;;  %v507_v34 = vrot.slane %v506_v40, 2  ;;  %v533_v35 = vrot.slane %v532_v37, 4 }
  0x60   :  { %v582_v32 = vsel %vm561_vm4, %v517_v26, %v503_v20  ;;  %v520_v6 = vadd.f32 %v519_v28, %v518_v52  ;;  %v547_v45 = vrot.slane %v546_v25, 4 }
  0x61   :  { %v531_v38 = vadd.f32 %v530_v56, %v529_v21  ;;  %v544_v14 = vrot.slane %v543_v29, 1  ;;  %v508_v41 = vadd.f32 %v507_v34, %v506_v40  ;;  %v534_v43 = vadd.f32 %v533_v35, %v532_v37 }
  0x62   :  { %v521_v44 = vrot.slane %v520_v6, 2  ;;  %v548_v48 = vadd.f32 %v547_v45, %v546_v25 }
  0x63   :  { %v545_v24 = vadd.f32 %v544_v14, %v543_v29  ;;  %v583_v13 = vsel %vm563_vm5, %v531_v38, %v582_v32  ;;  %v509_v46 = vrot.slane %v508_v41, 1  ;;  %v535_v47 = vrot.slane %v534_v43, 2 }
  0x64   :  { %v522_v33 = vadd.f32 %v521_v44, %v520_v6  ;;  %v549_v5 = vrot.slane %v548_v48, 2 }
  0x65   :  { %v584_v42 = vsel %vm565_vm6, %v545_v24, %v583_v13  ;;  %v536_v49 = vadd.f32 %v535_v47, %v534_v43  ;;  %v510_v27 = vadd.f32 %v509_v46, %v508_v41 }
  0x66   :  { %590 = vst [vmem:[#allocation8 + $0x10] sm:$0xf0] %v584_v42  ;;  %v523_v50 = vrot.slane %v522_v33, 1  ;;  %v550_v51 = vadd.f32 %v549_v5, %v548_v48 }
  0x67   :  { %v537_v10 = vrot.slane %v536_v49, 1 }
  0x68   :  { %v524_v36 = vadd.f32 %v523_v50, %v522_v33  ;;  %v551_v54 = vrot.slane %v550_v51, 1 }
  0x69   :  { %v538_v53 = vadd.f32 %v537_v10, %v536_v49 }
  0x6a   :  { %v585_v55 = vsel %vm561_vm4, %v524_v36, %v510_v27  ;;  %v552_v58 = vadd.f32 %v551_v54, %v550_v51 }
  0x6b   :  { %v586_v57 = vsel %vm563_vm5, %v538_v53, %v585_v55 }
  0x6c   :  { %v587_v59 = vsel %vm565_vm6, %v552_v58, %v586_v57 }
  0x6d   :  { %591 = vst [vmem:[#allocation8 + $0x18] sm:$0xf0] %v587_v59 }
  0x6e   :  { %604 = dma.vmem_to_hbm [thread:$0]  %s597_s27, 512, %s599_s30, [#allocation4], %s721_s20, %s721_s20, %s722_s21  }
  0x6f   :  { %718 = dma.done.wait [#allocation4], 512  }
  0x70   :  { %719 = vsyncadd [#allocation4], 4294966784 }
  0x71   :  { %609 = vsyncpa [#allocation3], 1 }
  0x72   :  { %610 = vsyncpa [#allocation6], 1 }
  0x73   :  { %611 = vsyncpa [#allocation4], 1 }

</bundles_post_ra>
